<compile_context>
chip_gen: v7x
topology: tpu7x:2x2x1
jax: 0.10.0
libtpu: 0.0.40
codegen_flags: <defaults>
</compile_context>

<pallas_src>
import functools

import jax
import jax.numpy as jnp
from jax.experimental import pallas as pl
from jax.experimental.pallas import tpu as pltpu

_LANE = 128


def planner_kernel(alphas_ref,              # (2,) f32 in SMEM: PReLU alphas
                   xt_ref,                  # (F,  tile_b) bf16   (feature-major x)
                   w1t_ref, b1_ref,         # (H1, F)  bf16, (H1, 1) f32
                   w2t_ref, b2_ref,         # (H2, H1) bf16 (BN1 folded), (H2, 1) f32
                   w3t_ref, b3_ref,         # (O,  H2) bf16 (BN2 folded), (O, 1)  f32
                   ot_ref):                 # (O,  tile_b) bf16
    """Fused MLP forward for one batch tile, batch on the 128-lane axis."""
    a1 = alphas_ref[0]
    a2 = alphas_ref[1]

    x = xt_ref[...].astype(jnp.bfloat16)    # no-op if already bf16

    # ---- Linear(input_size, 48) + PReLU     (Dropout = identity in eval) ---
    h = jnp.dot(w1t_ref[...], x, preferred_element_type=jnp.float32) + b1_ref[...]
    h = jnp.where(h > 0.0, h, a1 * h)

    # ---- BatchNorm1d(48) folded into W2/b2; Linear(48, 32) + PReLU ---------
    h = jnp.dot(w2t_ref[...], h.astype(jnp.bfloat16),
                preferred_element_type=jnp.float32) + b2_ref[...]
    h = jnp.where(h > 0.0, h, a2 * h)

    # ---- BatchNorm1d(32) folded into W3/b3; Linear(32, output_size) --------
    out = jnp.dot(w3t_ref[...], h.astype(jnp.bfloat16),
                  preferred_element_type=jnp.float32) + b3_ref[...]
    ot_ref[...] = out.astype(ot_ref.dtype)


def _round_up(n, m):
    return ((n + m - 1) // m) * m


def _pick_tile(batch, tile_b):
    """Lane-aligned batch tile; >= 2 grid steps when enough rows (v7x 2 TCs)."""
    bp = _round_up(max(batch, 1), _LANE)
    tb = min(_round_up(tile_b, _LANE), bp)
    if bp >= 2 * _LANE:
        tb = min(tb, _round_up(pl.cdiv(bp, 2), _LANE))
    return tb


@functools.partial(jax.jit, static_argnames=("tile_b",))
def imitation_planner_forward(x, kernel_params, tile_b=2048):
    """x: (B, input_size) float.  Returns (B, output_size) float32."""
    alphas, w1t, b1, w2t, b2, w3t, b3 = kernel_params
    B, F = x.shape
    H1 = w1t.shape[0]          # 48
    H2 = w2t.shape[0]          # 32
    O = w3t.shape[0]

    tb = _pick_tile(B, tile_b)
    Bp = _round_up(B, tb)

    # Single fused relayout op: pad ragged tail, batch -> lane axis, bf16 cast.
    xt = jnp.pad(x, ((0, Bp - B), (0, 0))).T.astype(jnp.bfloat16)    # (F, Bp)

    def rep(shape):
        # parameters: same (single full-extent) block for every grid step
        return pl.BlockSpec(shape, lambda i: (0,) * len(shape))

    cost = pl.CostEstimate(
        flops=2 * Bp * (F * H1 + H1 * H2 + H2 * O),
        transcendentals=0,
        bytes_accessed=(F * Bp * 2 + O * Bp * 2            # x in, out writeback (bf16)
                        + (w1t.size + w2t.size + w3t.size) * 2
                        + (b1.size + b2.size + b3.size) * 4),
    )

    grid = (Bp // tb,)
    outT = pl.pallas_call(
        planner_kernel,
        out_shape=jax.ShapeDtypeStruct((O, Bp), jnp.bfloat16),
        grid=grid,
        in_specs=[
            pl.BlockSpec(memory_space=pltpu.MemorySpace.SMEM),    # PReLU alphas
            pl.BlockSpec((F, tb), lambda i: (0, i)),              # x tile (lane-dense)
            rep((H1, F)), rep((H1, 1)),
            rep((H2, H1)), rep((H2, 1)),
            rep((O, H2)), rep((O, 1)),
        ],
        out_specs=pl.BlockSpec((O, tb), lambda i: (0, i)),        # lane-dense store
        compiler_params=pltpu.CompilerParams(
            dimension_semantics=("parallel",)),
        cost_estimate=cost,
    )(alphas, xt, w1t, b1, w2t, b2, w3t, b3)

    # Module contract: (B, output_size) f32.  Slice+transpose+cast fuse into
    # one tiny op; feature-major consumers can use outT directly instead.
    return outT[:, :B].T.astype(jnp.float32)


def init_params(key, input_size, output_size, dtype=jnp.float32):
    """Deterministic init mirroring the module's parameter shapes (f32)."""
    H1, H2 = 48, 32
    eps = 1e-5
    ks = jax.random.split(key, 9)

    def linear(kw, kb, fan_in, fan_out):
        bound = 1.0 / jnp.sqrt(fan_in)
        w = jax.random.uniform(kw, (fan_in, fan_out), dtype, -bound, bound)
        b = jax.random.uniform(kb, (1, fan_out), dtype, -bound, bound)
        return w, b

    w1, b1 = linear(ks[0], ks[1], input_size, H1)
    w2, b2 = linear(ks[2], ks[3], H1, H2)
    w3, b3 = linear(ks[4], ks[5], H2, output_size)

    # PReLU single alpha (PyTorch default num_parameters=1, init 0.25)
    a1 = jnp.full((1, 1), 0.25, dtype)
    a2 = jnp.full((1, 1), 0.25, dtype)

    # BatchNorm1d (eval): fold (gamma, beta, running_mean, running_var) into
    # per-channel scale/shift with non-trivial values so the fold is exercised.
    def bn(kg, n):
        k1, k2, k3 = jax.random.split(kg, 3)
        gamma = 1.0 + 0.1 * jax.random.normal(k1, (n,), dtype)
        beta = 0.1 * jax.random.normal(k2, (n,), dtype)
        mean = 0.05 * jax.random.normal(k3, (n,), dtype)
        var = jnp.ones((n,), dtype)
        scale = gamma / jnp.sqrt(var + eps)
        shift = beta - mean * scale
        return scale.reshape(1, n), shift.reshape(1, n)

    s1, t1 = bn(ks[6], H1)
    s2, t2 = bn(ks[7], H2)

    return (w1, b1, a1, s1, t1, w2, b2, a2, s2, t2, w3, b3)


def prepare_kernel_params(params):
    """Fold BN into the following Linear, transpose to feature-major, pack alphas."""
    (w1, b1, a1, s1, t1, w2, b2, a2, s2, t2, w3, b3) = params
    # (h*s1 + t1) @ W2 + b2  ==  h @ (s1[:,None]*W2) + (b2 + t1@W2)
    w2f = s1.reshape(-1, 1) * w2
    b2f = b2 + t1 @ w2
    # (h*s2 + t2) @ W3 + b3  ==  h @ (s2[:,None]*W3) + (b3 + t2@W3)
    w3f = s2.reshape(-1, 1) * w3
    b3f = b3 + t2 @ w3
    alphas = jnp.stack([a1.reshape(()), a2.reshape(())]).astype(jnp.float32)
    bf = jnp.bfloat16
    f32 = jnp.float32
    return (alphas,
            w1.T.astype(bf),  b1.reshape(-1, 1).astype(f32),     # (48, F), (48, 1)
            w2f.T.astype(bf), b2f.reshape(-1, 1).astype(f32),    # (32, 48), (32, 1)
            w3f.T.astype(bf), b3f.reshape(-1, 1).astype(f32))    # (O, 32),  (O, 1)


def reference_forward(x, params):
    """Faithful plain-JAX eval-mode forward of the module (all f32)."""
    (w1, b1, a1, s1, t1, w2, b2, a2, s2, t2, w3, b3) = params
    h = x @ w1 + b1
    h = jnp.where(h > 0, h, a1[0, 0] * h)
    h = h * s1 + t1
    h = h @ w2 + b2
    h = jnp.where(h > 0, h, a2[0, 0] * h)
    h = h * s2 + t2
    return h @ w3 + b3


def matched_reference(x, kernel_params):
    """Plain-JAX model of the *exact* kernel math (same layout, casts, fold)."""
    alphas, w1t, b1, w2t, b2, w3t, b3 = kernel_params
    xt = x.T.astype(jnp.bfloat16)
    h = jnp.dot(w1t, xt, preferred_element_type=jnp.float32) + b1
    h = jnp.where(h > 0, h, alphas[0] * h)
    h = jnp.dot(w2t, h.astype(jnp.bfloat16),
                preferred_element_type=jnp.float32) + b2
    h = jnp.where(h > 0, h, alphas[1] * h)
    out = jnp.dot(w3t, h.astype(jnp.bfloat16),
                  preferred_element_type=jnp.float32) + b3
    return out.astype(jnp.bfloat16).T.astype(jnp.float32)


if __name__ == "__main__":
    key = jax.random.PRNGKey(0)
    k_param, k_x = jax.random.split(key)

    # Ragged batch (300 -> tile 256, padded to 512, grid=(2,), both v7x TCs busy)
    B, input_size, output_size = 300, 32, 16
    params = init_params(k_param, input_size, output_size)
    kparams = prepare_kernel_params(params)
    x = jax.random.normal(k_x, (B, input_size), jnp.float32)

    out = imitation_planner_forward(x, kparams)
    out = jax.block_until_ready(out)
    assert out.shape == (B, output_size)

    # Tight check against a plain-JAX model of the exact kernel math.
    matched = matched_reference(x, kparams)
    assert jnp.allclose(out, matched, atol=1e-2, rtol=1e-2), \
        float(jnp.max(jnp.abs(out - matched)))

    # Looser check against the faithful f32 eval-mode module forward
    # (difference is only bf16 rounding of x / weights / output).
    ref = reference_forward(x, params)
    assert jnp.allclose(out, ref, atol=5e-2, rtol=5e-2), \
        float(jnp.max(jnp.abs(out - ref)))

    print("KERNEL_OK")
</pallas_src>

<mosaic_0001>
module attributes {stable_mosaic.version = 11 : i64} {
  func.func @planner_kernel(%arg0: i32, %arg1: memref<2xf32, #tpu.memory_space<smem>>, %arg2: memref<32x256xbf16, #tpu.memory_space<vmem>>, %arg3: memref<48x32xbf16, #tpu.memory_space<vmem>>, %arg4: memref<48x1xf32, #tpu.memory_space<vmem>>, %arg5: memref<32x48xbf16, #tpu.memory_space<vmem>>, %arg6: memref<32x1xf32, #tpu.memory_space<vmem>>, %arg7: memref<16x32xbf16, #tpu.memory_space<vmem>>, %arg8: memref<16x1xf32, #tpu.memory_space<vmem>>, %arg9: memref<16x256xbf16, #tpu.memory_space<vmem>>) attributes {dimension_semantics = [#tpu.dimension_semantics<parallel>], iteration_bounds = array<i64: 2>, scalar_prefetch = 0 : i64, scratch_operands = 0 : i64, tpu.core_type = #tpu.core_type<tc>, window_params = [{transform_indices = @transform_0, window_bounds = array<i64: 2>}, {transform_indices = @transform_1, window_bounds = array<i64: 32, 256>}, {pipeline_mode = #tpu.pipeline_mode<synchronous>, transform_indices = @transform_2, window_bounds = array<i64: 48, 32>}, {pipeline_mode = #tpu.pipeline_mode<synchronous>, transform_indices = @transform_3, window_bounds = array<i64: 48, 1>}, {pipeline_mode = #tpu.pipeline_mode<synchronous>, transform_indices = @transform_4, window_bounds = array<i64: 32, 48>}, {pipeline_mode = #tpu.pipeline_mode<synchronous>, transform_indices = @transform_5, window_bounds = array<i64: 32, 1>}, {pipeline_mode = #tpu.pipeline_mode<synchronous>, transform_indices = @transform_6, window_bounds = array<i64: 16, 32>}, {pipeline_mode = #tpu.pipeline_mode<synchronous>, transform_indices = @transform_7, window_bounds = array<i64: 16, 1>}, {transform_indices = @transform_8, window_bounds = array<i64: 16, 256>}]} {
    %c0 = arith.constant 0 : index
    %0 = memref.load %arg1[%c0] : memref<2xf32, #tpu.memory_space<smem>>
    %c1 = arith.constant 1 : index
    %1 = memref.load %arg1[%c1] : memref<2xf32, #tpu.memory_space<smem>>
    %c0_0 = arith.constant 0 : index
    %c0_1 = arith.constant 0 : index
    %2 = vector.load %arg2[%c0_0, %c0_1] : memref<32x256xbf16, #tpu.memory_space<vmem>>, vector<32x256xbf16>
    %c0_2 = arith.constant 0 : index
    %c0_3 = arith.constant 0 : index
    %3 = vector.load %arg3[%c0_2, %c0_3] : memref<48x32xbf16, #tpu.memory_space<vmem>>, vector<48x32xbf16>
    %cst = arith.constant dense<0.000000e+00> : vector<48x256xf32>
    %4 = tpu.matmul %3, %2, %cst {dimension_numbers = #tpu.dot_dimension_numbers<[1], [0], [0], [1], [0, 0, 1, 1], [], []>} : vector<48x32xbf16>, vector<32x256xbf16>, vector<48x256xf32> -> vector<48x256xf32>
    %c0_4 = arith.constant 0 : index
    %c0_5 = arith.constant 0 : index
    %5 = vector.load %arg4[%c0_4, %c0_5] : memref<48x1xf32, #tpu.memory_space<vmem>>, vector<48x1xf32>
    %6 = vector.broadcast %5 : vector<48x1xf32> to vector<48x256xf32>
    %7 = arith.addf %4, %6 : vector<48x256xf32>
    %cst_6 = arith.constant 0.000000e+00 : f32
    %8 = vector.broadcast %cst_6 : f32 to vector<48x256xf32>
    %9 = arith.cmpf ogt, %7, %8 : vector<48x256xf32>
    %10 = vector.broadcast %0 : f32 to vector<48x256xf32>
    %11 = arith.mulf %10, %7 : vector<48x256xf32>
    %12 = arith.select %9, %7, %11 : vector<48x256xi1>, vector<48x256xf32>
    %c0_7 = arith.constant 0 : index
    %c0_8 = arith.constant 0 : index
    %13 = vector.load %arg5[%c0_7, %c0_8] : memref<32x48xbf16, #tpu.memory_space<vmem>>, vector<32x48xbf16>
    %14 = arith.truncf %12 : vector<48x256xf32> to vector<48x256xbf16>
    %cst_9 = arith.constant dense<0.000000e+00> : vector<32x256xf32>
    %15 = tpu.matmul %13, %14, %cst_9 {dimension_numbers = #tpu.dot_dimension_numbers<[1], [0], [0], [1], [0, 0, 1, 1], [], []>} : vector<32x48xbf16>, vector<48x256xbf16>, vector<32x256xf32> -> vector<32x256xf32>
    %c0_10 = arith.constant 0 : index
    %c0_11 = arith.constant 0 : index
    %16 = vector.load %arg6[%c0_10, %c0_11] : memref<32x1xf32, #tpu.memory_space<vmem>>, vector<32x1xf32>
    %17 = vector.broadcast %16 : vector<32x1xf32> to vector<32x256xf32>
    %18 = arith.addf %15, %17 : vector<32x256xf32>
    %cst_12 = arith.constant 0.000000e+00 : f32
    %19 = vector.broadcast %cst_12 : f32 to vector<32x256xf32>
    %20 = arith.cmpf ogt, %18, %19 : vector<32x256xf32>
    %21 = vector.broadcast %1 : f32 to vector<32x256xf32>
    %22 = arith.mulf %21, %18 : vector<32x256xf32>
    %23 = arith.select %20, %18, %22 : vector<32x256xi1>, vector<32x256xf32>
    %c0_13 = arith.constant 0 : index
    %c0_14 = arith.constant 0 : index
    %24 = vector.load %arg7[%c0_13, %c0_14] : memref<16x32xbf16, #tpu.memory_space<vmem>>, vector<16x32xbf16>
    %25 = arith.truncf %23 : vector<32x256xf32> to vector<32x256xbf16>
    %cst_15 = arith.constant dense<0.000000e+00> : vector<16x256xf32>
    %26 = tpu.matmul %24, %25, %cst_15 {dimension_numbers = #tpu.dot_dimension_numbers<[1], [0], [0], [1], [0, 0, 1, 1], [], []>} : vector<16x32xbf16>, vector<32x256xbf16>, vector<16x256xf32> -> vector<16x256xf32>
    %c0_16 = arith.constant 0 : index
    %c0_17 = arith.constant 0 : index
    %27 = vector.load %arg8[%c0_16, %c0_17] : memref<16x1xf32, #tpu.memory_space<vmem>>, vector<16x1xf32>
    %28 = vector.broadcast %27 : vector<16x1xf32> to vector<16x256xf32>
    %29 = arith.addf %26, %28 : vector<16x256xf32>
    %30 = arith.truncf %29 : vector<16x256xf32> to vector<16x256xbf16>
    %c0_18 = arith.constant 0 : index
    %c0_19 = arith.constant 0 : index
    %31 = vector.load %arg9[%c0_18, %c0_19] : memref<16x256xbf16, #tpu.memory_space<vmem>>, vector<16x256xbf16>
    tpu.vector_store %arg9[%c0_18, %c0_19], %30 {strides = array<i32>} : memref<16x256xbf16, #tpu.memory_space<vmem>>, vector<16x256xbf16>,
    return
  }
  func.func @transform_0(%arg0: i32) -> i32 {
    %c0_i32 = arith.constant 0 : i32
    %c0_i32_0 = arith.constant 0 : i32
    return %c0_i32 : i32
  }
  func.func @transform_1(%arg0: i32) -> (i32, i32) {
    %c0_i32 = arith.constant 0 : i32
    %c0_i32_0 = arith.constant 0 : i32
    return %c0_i32, %arg0 : i32, i32
  }
  func.func @transform_2(%arg0: i32) -> (i32, i32) {
    %c0_i32 = arith.constant 0 : i32
    %c0_i32_0 = arith.constant 0 : i32
    %c0_i32_1 = arith.constant 0 : i32
    return %c0_i32, %c0_i32_0 : i32, i32
  }
  func.func @transform_3(%arg0: i32) -> (i32, i32) {
    %c0_i32 = arith.constant 0 : i32
    %c0_i32_0 = arith.constant 0 : i32
    %c0_i32_1 = arith.constant 0 : i32
    return %c0_i32, %c0_i32_0 : i32, i32
  }
  func.func @transform_4(%arg0: i32) -> (i32, i32) {
    %c0_i32 = arith.constant 0 : i32
    %c0_i32_0 = arith.constant 0 : i32
    %c0_i32_1 = arith.constant 0 : i32
    return %c0_i32, %c0_i32_0 : i32, i32
  }
  func.func @transform_5(%arg0: i32) -> (i32, i32) {
    %c0_i32 = arith.constant 0 : i32
    %c0_i32_0 = arith.constant 0 : i32
    %c0_i32_1 = arith.constant 0 : i32
    return %c0_i32, %c0_i32_0 : i32, i32
  }
  func.func @transform_6(%arg0: i32) -> (i32, i32) {
    %c0_i32 = arith.constant 0 : i32
    %c0_i32_0 = arith.constant 0 : i32
    %c0_i32_1 = arith.constant 0 : i32
    return %c0_i32, %c0_i32_0 : i32, i32
  }
  func.func @transform_7(%arg0: i32) -> (i32, i32) {
    %c0_i32 = arith.constant 0 : i32
    %c0_i32_0 = arith.constant 0 : i32
    %c0_i32_1 = arith.constant 0 : i32
    return %c0_i32, %c0_i32_0 : i32, i32
  }
  func.func @transform_8(%arg0: i32) -> (i32, i32) {
    %c0_i32 = arith.constant 0 : i32
    %c0_i32_0 = arith.constant 0 : i32
    return %c0_i32, %arg0 : i32, i32
  }
}

</mosaic_0001>

<bundles_post_ra>
// kernel: imitation_planner_forward.1
= control target key start
LH: loop header
LB: loop body
LE: loop exit
PB: predicated region body
PF: predicated region fallthrough
CT: control target
= control target key end

     0   :  { %13 = vsyncpa [#allocation3], 0  ;;  %s1063_s27 = smov 0   ;;  %s1065_s28 = smov 0   ;;  %s1231_s0 = inlined_call_operand.vmem [shape: f32[2], index: 0, kind: input, shape index: {}]   ;;  %s1232_s1 = inlined_call_operand.vmem [shape: bf16[32,512], index: 1, kind: input, shape index: {}]   ;;  %s1233_s2 = inlined_call_operand.vmem [shape: bf16[48,32], index: 2, kind: input, shape index: {}]   ;;  %s1234_s3 = inlined_call_operand.vmem [shape: f32[48,1], index: 3, kind: input, shape index: {}]   ;;  %s1235_s4 = inlined_call_operand.vmem [shape: bf16[32,48], index: 4, kind: input, shape index: {}]   ;;  %s1236_s5 = inlined_call_operand.vmem [shape: f32[32,1], index: 5, kind: input, shape index: {}]   ;;  %s1237_s6 = inlined_call_operand.vmem [shape: bf16[16,32], index: 6, kind: input, shape index: {}]   ;;  %s1238_s7 = inlined_call_operand.vmem [shape: f32[16,1], index: 7, kind: input, shape index: {}]   ;;  %s1239_s8 = inlined_call_operand.vmem [shape: bf16[16,512], index: 8, kind: output, shape index: {}]  }
   0x1   :  { %s1067_s29 = smov 0  }
   0x2 LB: > { %s1079_s30 = sadd.s32 4294967295, %s1014_s29   ;;  %s1082_s9 = sadd.s32 1, %s1014_s29   ;;  %s1014_s29 = sphi %s1067_s29, %s1246_s29   ;;  %s1010_s28 = sphi %s1065_s28, %s1245_s28   ;;  %s1006_s27 = sphi %s1063_s27, %s1244_s27  }
   0x3   : > { %s44_s10 = ssub.s32 %s1014_s29, %s1082_s9  ;;  %s47_s11 = sadd.s32 1, %s1010_s28 }
   0x4   : > { %p45_p0 = scmp.eq.s32.totalorder %s44_s10, 0  ;;  %p54_p1 = scmp.ne.s32.totalorder %s1010_s28, %s1006_s27 }
   0x5   : > { %p55_p2 = scmp.eq.s32.totalorder %s1014_s29, 0  ;;  %p210_p3 = scmp.eq.s32.totalorder %s1079_s30, 1 }
   0x6   : > { %s1092_s12 = scalar_select %p45_p0, %s1010_s28, %s47_s11  }
   0x7   : > { %p1094_p4 = por %p55_p2, %p54_p1  ;;  %p1098_p5 = por %p210_p3, %p54_p1 }
   0x8   : > { %p885_p6 = scmp.ge.s32.totalorder %s1014_s29, 1  ;;  %p223_p7 = scmp.lt.s32.totalorder %s1014_s29, 3 }
   0x9   : > { %s1241_s14 = scalar_select %p1098_p5, 1, 0 }
   0xa   : > { %p931_p8 = scmp.eq.s32.totalorder %s1079_s30, 0  ;;  %p1105_p9 = pnand %p885_p6, %p223_p7 }
   0xb   : > { %s236_s18 = sshll.u32 %s1231_s0, 4  ;;  %s237_s18 = int_to_ptr.vmem [resolvable:$true] %s236_s18 }
   0xc   : > { %p927_p10 = pneg %p1105_p9  ;;  %s973_s19 = scalar_lea.vmem %s237_s18, 16 }
   0xd   : > { %p974_p12 = scmp.ne.s32.totalorder %s237_s18, %s973_s19  ;;  %p981_p2 = scmp.lt.s32.totalorder %s237_s18, %s237_s18 }
   0xe   : > { %p928_p11 = pnand %p931_p8, %p927_p10  ;;  %p982_p3 = scmp.lt.s32.totalorder %s973_s19, %s973_s19 }
  0x10   : > { %p975_p13 = pneg %p928_p11  ;;  %p983_p6 = por %p982_p3, %p981_p2 }
  0x12   : > { %p976_p0 = pnand %p975_p13, %p974_p12 }
  0x14   : > { %p977_p1 = pneg %p976_p0 }
  0x16   : > { %p984_p7 = pnand %p983_p6, %p977_p1 }
  0x18   : > { %987 = shalt.err (!%p984_p7)
}
  0x19   : > { %s1016_s20 = smov [#allocation2]   ;;  %p887_p5 = scmp.ge.s32.totalorder %s1014_s29, 2 }
  0x1a   : > { %930 = dma.vmem_to_smem (!%p928_p11), %s237_s18, 16, %s1016_s20, [#allocation3]  }
  0x1b   : > { %261 = sbr.rel (%p887_p5) target bundleno = 41 (0x29), region = 44 }
  0x22   : > { %264 = sbr.rel (!%p1094_p4) target bundleno = 41 (0x29), region = 48  ;;  %s266_s21 = sand.u32 (%p1094_p4), 1, %s1010_s28  }
  0x23   : > { %s919_s22 = sshll.u32 (%p1094_p4), %s1014_s29, 3  ;;  %s888_s23 = sshll.u32 (%p1094_p4), %s266_s21, 5 }
  0x24   : > { %s271_s26 = scalar_lea.vmem (%p1094_p4), %s1232_s1, %s919_s22  ;;  %s268_s10 = scalar_lea.vmem (%p1094_p4), [#allocation4], %s888_s23 }
  0x25   : > { %v305_v0 = vld [vmem:[%s271_s26] sm:$0xff] (%p1094_p4)  ;;  %v307_v1 = vld [vmem:[%s271_s26 + $0x10] sm:$0xff] (%p1094_p4) }
  0x26   : > { %v309_v2 = vld [vmem:[%s271_s26 + $0x20] sm:$0xff] (%p1094_p4)  ;;  %306 = vst [vmem:[%s268_s10] sm:$0xff] (%p1094_p4), %v305_v0  ;;  %308 = vst [vmem:[%s268_s10 + $0x8] sm:$0xff] (%p1094_p4), %v307_v1  ;;  %v311_v3 = vld [vmem:[%s271_s26 + $0x30] sm:$0xff] (%p1094_p4) }
  0x27   : > { %310 = vst [vmem:[%s268_s10 + $0x10] sm:$0xff] (%p1094_p4), %v309_v2  ;;  %312 = vst [vmem:[%s268_s10 + $0x18] sm:$0xff] (%p1094_p4), %v311_v3 }
  0x29 PF: > { %321 = sbr.rel (%p1105_p9) target bundleno = 767 (0x2ff), region = 86 }
  0x30   : > { %1001 = dma.done.wait (%p931_p8), [#allocation3], 16  }
  0x31   : > { %1003 = vsyncadd (%p931_p8), [#allocation3], 4294967280  ;;  %s328_s29 = sand.u32 1, %s1006_s27  }
  0x32   : > { %s893_s11 = sshll.u32 %s328_s29, 5 }
  0x33   : > { %s330_s13 = scalar_lea.vmem [#allocation4], %s893_s11 }
  0x34   : > { %334 = sfence }
  0x35   : > { %v961_v4 = vld [vmem:[%s330_s13 + $0x4] ss:$8 sps:$4 sm:$0xff]   ;;  %v963_v5 = vld [vmem:[%s330_s13] ss:$8 sps:$4 sm:$0xff]   ;;  %v1017_v6 = vmov 0   ;;  %v378_v11 = vld [vmem:[%s1234_s3 + $0x10] sm:$0xff] }
  0x36   : > { %489 = vmatprep.mubr.bf16.mxu0 %v1017_v6  ;;  %959 = vset.pattern.permute.xlu0 %v1017_v6  ;;  %v964_v7 = vld [vmem:[%s330_s13 + $0x14] ss:$8 sps:$4 sm:$0xff]   ;;  %v966_v8 = vld [vmem:[%s330_s13 + $0x10] ss:$8 sps:$4 sm:$0xff]   ;;  %v376_v9 = vld [vmem:[%s1234_s3] sm:$0xff]  ;;  %vm447_vm0 = vcmask 261120  }
  0x37   : > { %457 = vmatprep.subr.bf16.mxu0 %v961_v4  ;;  %960 = vset.pattern.permute.xlu1 %v1017_v6  ;;  %v967_v10 = vld [vmem:[%s1233_s2] sm:$0xff]   ;;  %v377_v12 = vld [vmem:[%s1234_s3 + $0x8] sm:$0xff]  ;;  %v379_v13 = vld [vmem:[%s1234_s3 + $0x18] sm:$0xff]  ;;  %s364_s15 = sld [smem:[#allocation2]]  ;;  %vm601_vm13 = vcmask 392192   ;;  %s895_s20 = sld [smem:[#allocation2 + $0x1]] }
  0x38   : > { %458 = vmatpush1.bf16.msra.mxu0 %v963_v5  ;;  %640 = vmatprep.mubr.bf16.mxu1 %v1017_v6  ;;  %v380_v14 = vld [vmem:[%s1234_s3 + $0x20] sm:$0xff]  ;;  %v381_v15 = vld [vmem:[%s1234_s3 + $0x28] sm:$0xff]  ;;  %v569_v19 = vld [vmem:[%s1236_s5 + $0x10] sm:$0xff]  ;;  %s894_s23 = sshll.u32 %s328_s29, 4  ;;  %p1243_p4 = scmp.ne.s32.totalorder %s1241_s14, 0 }
  0x39   : > { %459 = vmatprep.subr.bf16.mxu0 %v964_v7  ;;  %384 = vperm.xlu0 %959, %v376_v9   ;;  %v968_v16 = vld [vmem:[%s1233_s2 + $0x8] sm:$0xff]   ;;  %v567_v17 = vld [vmem:[%s1236_s5] sm:$0xff]  ;;  %v570_v20 = vld [vmem:[%s1236_s5 + $0x18] sm:$0xff]  ;;  %s360_s24 = scalar_lea.vmem [#allocation5], %s894_s23  ;;  %s922_s25 = sshll.u32 (%p1243_p4), %s1079_s30, 3 }
  0x3a   : > { %394 = vperm.xlu1 %960, %v378_v11   ;;  %v568_v18 = vld [vmem:[%s1236_s5 + $0x8] sm:$0xff]  ;;  %v969_v21 = vld [vmem:[%s1233_s2 + $0x10] sm:$0xff]   ;;  %v692_v22 = vld [vmem:[%s1238_s7] sm:$0xff]  ;;  %s778_s26 = scalar_lea.vmem (%p1243_p4), %s1239_s8, %s922_s25 }
  0x3b   : > { %v693_v23 = vld [vmem:[%s1238_s7 + $0x8] sm:$0xff] }
  0x3c   : > { %460 = vmatpush1.bf16.msra.mxu0 %v966_v8 }
  0x3d   : > { %389 = vperm.xlu0 %959, %v377_v12   ;;  %v1187_v26 = vstv %s364_s15 }
  0x3e   : > { %399 = vperm.xlu1 %960, %v379_v13  }
  0x3f   : > { %903 = vmatmul.mubr.msk.bf16.vlgmr.msra.gmra.mrb[0].mxu0 %vm447_vm0, %v967_v10 }
  0x40   : > { %499 = vmatprep.mubr.bf16.mxu0 %v1017_v6 }
  0x41   : > { %404 = vperm.xlu0 %959, %v380_v14  }
  0x42   : > { %409 = vperm.xlu1 %960, %v381_v15  }
  0x45   : > { %573 = vperm.xlu0 %959, %v567_v17  }
  0x46   : > { %578 = vperm.xlu1 %960, %v568_v18  }
  0x47   : > { %904 = vmatmul.mubr.msk.bf16.gmra.mrb[4].mxu0 %vm447_vm0, %v968_v16 }
  0x48   : > { %509 = vmatprep.mubr.bf16.mxu0 %v1017_v6 }
  0x49   : > { %583 = vperm.xlu0 %959, %v569_v19  }
  0x4a   : > { %588 = vperm.xlu1 %960, %v570_v20  }
  0x4d   : > { %696 = vperm.xlu0 %959, %v692_v22   ;;  %v970_v22 = vld [vmem:[%s1235_s4] sm:$0xff]  }
  0x4e   : > { %701 = vperm.xlu1 %960, %v693_v23   ;;  %v971_v23 = vld [vmem:[%s1235_s4 + $0x8] sm:$0xff]  }
  0x4f   : > { %905 = vmatmul.mubr.msk.bf16.gmra.mrb[8].mxu0 %vm447_vm0, %v969_v21 }
  0xb8   : > { %v385_v24 = vpop.permute.xlu0 %384 }
  0xb9   : > { %v395_v35 = vpop.permute.xlu1 %394 }
  0xbc   : > { %v390_v29 = vpop.permute.xlu0 %389 }
  0xbd   : > { %v400_v49 = vpop.permute.xlu1 %399 }
  0xc0   : > { %v405_v61 = vpop.permute.xlu0 %404 }
  0xc1   : > { %v410_v5 = vpop.permute.xlu1 %409 }
 0x112   : > { %v491_v25 = vpop.f32.mrb[0].mxu0 }
 0x113   : > { %v492_v27 = vadd.f32 %v491_v25, %v385_v24  ;;  %v493_v28 = vpop.f32.mrb[1].mxu0 }
 0x114   : > { %v494_v30 = vadd.f32 %v493_v28, %v385_v24  ;;  %v495_v31 = vpop.f32.mrb[2].mxu0  ;;  %v574_v24 = vpop.permute.xlu0 %573 }
 0x115   : > { %v533_v32 = vmul.f32 %v1187_v26, %v492_v27  ;;  %v496_v33 = vadd.f32 %v495_v31, %v390_v29  ;;  %v497_v34 = vpop.f32.mrb[3].mxu0  ;;  %vm520_vm1 = vcmp.gt.f32.partialorder %v492_v27, 0.0 }
 0x116   : > { %v534_v36 = vmul.f32 %v1187_v26, %v494_v30  ;;  %v498_v37 = vadd.f32 %v497_v34, %v390_v29  ;;  %vm521_vm2 = vcmp.gt.f32.partialorder %v494_v30, 0.0  ;;  %v579_v29 = vpop.permute.xlu1 %578 }
 0x117   : > { %v535_v38 = vmul.f32 %v1187_v26, %v496_v33  ;;  %vm522_vm3 = vcmp.gt.f32.partialorder %v496_v33, 0.0  ;;  %v545_v40 = vsel %vm520_vm1, %v492_v27, %v533_v32 }
 0x118   : > { %v536_v39 = vmul.f32 %v1187_v26, %v498_v37  ;;  %vm523_vm4 = vcmp.gt.f32.partialorder %v498_v37, 0.0  ;;  %v546_v43 = vsel %vm521_vm2, %v494_v30, %v534_v36 }
 0x119   : > { %v547_v41 = vsel %vm522_vm3, %v496_v33, %v535_v38 }
 0x11a   : > { %v501_v42 = vpop.f32.mrb[4].mxu0  ;;  %v548_v44 = vsel %vm523_vm4, %v498_v37, %v536_v39  ;;  %v561_v45 = vpack.c.bf16 %v547_v41, %v545_v40  ;;  %v584_v40 = vpop.permute.xlu0 %583 }
 0x11b   : > { %v502_v46 = vadd.f32 %v501_v42, %v395_v35  ;;  %v503_v47 = vpop.f32.mrb[5].mxu0  ;;  %v562_v48 = vpack.c.bf16 %v548_v44, %v546_v43 }
 0x11c   : > { %v504_v50 = vadd.f32 %v503_v47, %v395_v35  ;;  %v505_v51 = vpop.f32.mrb[6].mxu0 }
 0x11d   : > { %v537_v52 = vmul.f32 %v1187_v26, %v502_v46  ;;  %v506_v53 = vadd.f32 %v505_v51, %v400_v49  ;;  %v507_v54 = vpop.f32.mrb[7].mxu0  ;;  %608 = vmatprep.subr.bf16.mxu1 %v562_v48  ;;  %vm524_vm5 = vcmp.gt.f32.partialorder %v502_v46, 0.0  ;;  %v589_v48 = vpop.permute.xlu1 %588 }
 0x11e   : > { %v538_v55 = vmul.f32 %v1187_v26, %v504_v50  ;;  %v508_v56 = vadd.f32 %v507_v54, %v400_v49  ;;  %609 = vmatpush1.bf16.msra.mxu1 %v561_v45  ;;  %vm525_vm6 = vcmp.gt.f32.partialorder %v504_v50, 0.0 }
 0x11f   : > { %vm526_vm7 = vcmp.gt.f32.partialorder %v506_v53, 0.0  ;;  %v539_v57 = vmul.f32 %v1187_v26, %v506_v53  ;;  %v549_v59 = vsel %vm524_vm5, %v502_v46, %v537_v52 }
 0x120   : > { %vm527_vm8 = vcmp.gt.f32.partialorder %v508_v56, 0.0  ;;  %v540_v58 = vmul.f32 %v1187_v26, %v508_v56  ;;  %v550_v63 = vsel %vm525_vm6, %v504_v50, %v538_v55 }
 0x121   : > { %v551_v60 = vsel %vm526_vm7, %v506_v53, %v539_v57 }
 0x122   : > { %v511_v62 = vpop.f32.mrb[8].mxu0  ;;  %v552_v0 = vsel %vm527_vm8, %v508_v56, %v540_v58  ;;  %v563_v1 = vpack.c.bf16 %v551_v60, %v549_v59 }
 0x123   : > { %v512_v2 = vadd.f32 %v511_v62, %v405_v61  ;;  %v513_v3 = vpop.f32.mrb[9].mxu0  ;;  %v564_v4 = vpack.c.bf16 %v552_v0, %v550_v63  ;;  %v972_v0 = vld [vmem:[%s1237_s6] sm:$0xff]  }
 0x124   : > { %v514_v7 = vadd.f32 %v513_v3, %v405_v61  ;;  %v515_v8 = vpop.f32.mrb[10].mxu0 }
 0x125   : > { %v541_v9 = vmul.f32 %v1187_v26, %v512_v2  ;;  %v516_v10 = vadd.f32 %v515_v8, %v410_v5  ;;  %v517_v11 = vpop.f32.mrb[11].mxu0  ;;  %610 = vmatprep.subr.bf16.mxu1 %v564_v4  ;;  %vm528_vm9 = vcmp.gt.f32.partialorder %v512_v2, 0.0 }
 0x126   : > { %v542_v12 = vmul.f32 %v1187_v26, %v514_v7  ;;  %v518_v13 = vadd.f32 %v517_v11, %v410_v5  ;;  %611 = vmatpush1.bf16.msra.mxu1 %v563_v1  ;;  %vm529_vm10 = vcmp.gt.f32.partialorder %v514_v7, 0.0  ;;  %v697_v1 = vpop.permute.xlu0 %696  ;;  %v702_v5 = vpop.permute.xlu1 %701 }
 0x127   : > { %vm530_vm11 = vcmp.gt.f32.partialorder %v516_v10, 0.0  ;;  %v543_v14 = vmul.f32 %v1187_v26, %v516_v10  ;;  %v553_v16 = vsel %vm528_vm9, %v512_v2, %v541_v9 }
 0x128   : > { %vm531_vm12 = vcmp.gt.f32.partialorder %v518_v13, 0.0  ;;  %v544_v15 = vmul.f32 %v1187_v26, %v518_v13  ;;  %v554_v18 = vsel %vm529_vm10, %v514_v7, %v542_v12  ;;  %v669_v26 = vstv %s895_s20 }
 0x129   : > { %v555_v17 = vsel %vm530_vm11, %v516_v10, %v543_v14 }
 0x12a   : > { %v556_v19 = vsel %vm531_vm12, %v518_v13, %v544_v15  ;;  %v565_v20 = vpack.c.bf16 %v555_v17, %v553_v16 }
 0x12b   : > { %v566_v21 = vpack.c.bf16 %v556_v19, %v554_v18 }
 0x12d   : > { %612 = vmatprep.subr.bf16.mxu1 %v566_v21 }
 0x12e   : > { %613 = vmatpush1.bf16.msra.mxu1 %v565_v20 }
 0x131   : > { %908 = vmatmul.mubr.msk.bf16.vlgmr.msra.gmra.mrb[0].mxu1 %vm601_vm13, %v970_v22 }
 0x132   : > { %650 = vmatprep.mubr.bf16.mxu1 %v1017_v6 }
 0x139   : > { %909 = vmatmul.mubr.msk.bf16.gmra.mrb[4].mxu1 %vm601_vm13, %v971_v23 }
 0x13a   : > { %744 = vmatprep.mubr.bf16.mxu1 %v1017_v6 }
 0x204   : > { %v642_v25 = vpop.f32.mrb[0].mxu1 }
 0x205   : > { %v643_v27 = vadd.f32 %v642_v25, %v574_v24  ;;  %v644_v28 = vpop.f32.mrb[1].mxu1 }
 0x206   : > { %v645_v30 = vadd.f32 %v644_v28, %v574_v24  ;;  %v646_v31 = vpop.f32.mrb[2].mxu1 }
 0x207   : > { %v670_v32 = vmul.f32 %v669_v26, %v643_v27  ;;  %v647_v33 = vadd.f32 %v646_v31, %v579_v29  ;;  %v648_v34 = vpop.f32.mrb[3].mxu1  ;;  %vm661_vm14 = vcmp.gt.f32.partialorder %v643_v27, 0.0 }
 0x208   : > { %v671_v35 = vmul.f32 %v669_v26, %v645_v30  ;;  %v649_v36 = vadd.f32 %v648_v34, %v579_v29  ;;  %vm662_vm15 = vcmp.gt.f32.partialorder %v645_v30, 0.0 }
 0x209   : > { %vm663_vm1 = vcmp.gt.f32.partialorder %v647_v33, 0.0  ;;  %v672_v37 = vmul.f32 %v669_v26, %v647_v33  ;;  %v678_v38 = vsel %vm661_vm14, %v643_v27, %v670_v32 }
 0x20a   : > { %vm664_vm2 = vcmp.gt.f32.partialorder %v649_v36, 0.0  ;;  %v673_v6 = vmul.f32 %v669_v26, %v649_v36  ;;  %v679_v43 = vsel %vm662_vm15, %v645_v30, %v671_v35 }
 0x20b   : > { %v680_v39 = vsel %vm663_vm1, %v647_v33, %v672_v37 }
 0x20c   : > { %v688_v41 = vpack.c.bf16 %v680_v39, %v678_v38  ;;  %v652_v42 = vpop.f32.mrb[4].mxu1  ;;  %v681_v44 = vsel %vm664_vm2, %v649_v36, %v673_v6 }
 0x20d   : > { %v653_v45 = vadd.f32 %v652_v42, %v584_v40  ;;  %v654_v46 = vpop.f32.mrb[5].mxu1  ;;  %v689_v47 = vpack.c.bf16 %v681_v44, %v679_v43 }
 0x20e   : > { %v655_v49 = vadd.f32 %v654_v46, %v584_v40  ;;  %v656_v50 = vpop.f32.mrb[6].mxu1 }
 0x20f   : > { %v674_v51 = vmul.f32 %v669_v26, %v653_v45  ;;  %v657_v52 = vadd.f32 %v656_v50, %v589_v48  ;;  %v658_v53 = vpop.f32.mrb[7].mxu1  ;;  %712 = vmatprep.subr.bf16.mxu1 %v689_v47  ;;  %vm665_vm3 = vcmp.gt.f32.partialorder %v653_v45, 0.0 }
 0x210   : > { %v675_v54 = vmul.f32 %v669_v26, %v655_v49  ;;  %v659_v55 = vadd.f32 %v658_v53, %v589_v48  ;;  %713 = vmatpush1.bf16.msra.mxu1 %v688_v41  ;;  %vm666_vm4 = vcmp.gt.f32.partialorder %v655_v49, 0.0 }
 0x211   : > { %vm667_vm5 = vcmp.gt.f32.partialorder %v657_v52, 0.0  ;;  %v676_v56 = vmul.f32 %v669_v26, %v657_v52  ;;  %v682_v58 = vsel %vm665_vm3, %v653_v45, %v674_v51 }
 0x212   : > { %vm668_vm6 = vcmp.gt.f32.partialorder %v659_v55, 0.0  ;;  %v677_v57 = vmul.f32 %v669_v26, %v659_v55  ;;  %v683_v61 = vsel %vm666_vm4, %v655_v49, %v675_v54 }
 0x213   : > { %v684_v59 = vsel %vm667_vm5, %v657_v52, %v676_v56 }
 0x214   : > { %v690_v60 = vpack.c.bf16 %v684_v59, %v682_v58  ;;  %v685_v62 = vsel %vm668_vm6, %v659_v55, %v677_v57 }
 0x215   : > { %v691_v63 = vpack.c.bf16 %v685_v62, %v683_v61 }
 0x217   : > { %714 = vmatprep.subr.bf16.mxu1 %v691_v63 }
 0x218   : > { %715 = vmatpush1.bf16.msra.mxu1 %v690_v60 }
 0x21b   : > { %911 = vmatmul.mubr.msk.bf16.vlgmr.msra.gmra.mrb[8].mxu1 %vm447_vm0, %v972_v0 }
 0x2ee   : > { %v746_v2 = vpop.f32.mrb[8].mxu1 }
 0x2ef   : > { %v747_v3 = vadd.f32 %v746_v2, %v697_v1  ;;  %v748_v4 = vpop.f32.mrb[9].mxu1 }
 0x2f0   : > { %v749_v7 = vadd.f32 %v748_v4, %v697_v1  ;;  %v750_v8 = vpop.f32.mrb[10].mxu1  ;;  %775 = sbr.rel (!%p1243_p4) target bundleno = 767 (0x2ff), region = 98 }
 0x2f1   : > { %v751_v9 = vadd.f32 %v750_v8, %v702_v5  ;;  %v752_v10 = vpop.f32.mrb[11].mxu1 }
 0x2f2   : > { %v920_v11 = vpack.c.bf16 %v749_v7, %v747_v3  ;;  %v753_v12 = vadd.f32 %v752_v10, %v702_v5 }
 0x2f4   : > { %767 = vst [vmem:[%s360_s24] sm:$0xff] %v920_v11  ;;  %v921_v13 = vpack.c.bf16 %v753_v12, %v751_v9 }
 0x2f6   : > { %768 = vst [vmem:[%s360_s24 + $0x8] sm:$0xff] %v921_v13 }
 0x2fb   : > { %v808_v14 = vld [vmem:[%s360_s24] sm:$0xff] }
 0x2fc   : > { %809 = vst [vmem:[%s778_s26] sm:$0xff] %v808_v14 }
 0x2fd   : > { %v810_v15 = vld [vmem:[%s360_s24 + $0x8] sm:$0xff] }
 0x2fe   : > { %811 = vst [vmem:[%s778_s26 + $0x10] sm:$0xff] %v810_v15 }
 0x2ff PF: > { %p16_p5 = scmp.ge.s32.totalorder %s1082_s9, 4   ;;  %s1244_s27 = smov %s1010_s28 }
 0x300   : > { %s1245_s28 = smov %s1092_s12  ;;  %s1246_s29 = smov %s1082_s9 }
 0x301   :  { %18 = sbr.rel (!%p16_p5) target bundleno = 2 (0x2), region = 168 }
 0x308   :  { %827 = vsyncpa [#allocation3], 1 }
 0x309   :  { %829 = vsyncpa [#allocation3 + $0x1], 1 }

</bundles_post_ra>
